<compile_context>
chip_gen: v6e
topology: v6e:2x2x1
jax: 0.10.0
libtpu: 0.0.40
codegen_flags: <defaults>
</compile_context>

<pallas_src>
import math

import jax
import jax.numpy as jnp
import numpy as np
from jax.experimental import pallas as pl
from jax.experimental.pallas import tpu as pltpu

_VMEM_LIMIT_BYTES = 32 * 1024 * 1024      # safe on v5e (128 MiB phys), v6e (128), v7x (64)
_MAX_LANE_TILE = 8192                     # lane-dim tile cap (f32: 32 KiB/row of a block)


# ----------------------------- stage 1: cumsums ------------------------------

def _make_cumsum_kernel(bb, normalize, scale):
    def kernel(mask_ref, ly_ref, ux_ref, emb_ref):
        # mask_ref: (bb, H, W) int32 ; ly_ref: (H, H) bf16 ; ux_ref: (W, W) bf16
        # emb_ref : (bb, 2, H, W) f32
        ly = ly_ref[...]
        ux = ux_ref[...]
        for b in range(bb):                                   # static unroll (bb is small)
            not_mask = (1 - mask_ref[b]).astype(jnp.bfloat16)  # (H, W), exact {0,1}
            # cumsum along H:  L_y @ not_mask   (lower-triangular ones)  -- bf16 MXU, f32 acc
            y_embed = jnp.dot(ly, not_mask, preferred_element_type=jnp.float32)
            # cumsum along W:  not_mask @ U_x   (upper-triangular ones)
            x_embed = jnp.dot(not_mask, ux, preferred_element_type=jnp.float32)
            if normalize:
                eps = 1e-6
                y_embed = y_embed / (y_embed[-1:, :] + eps) * scale
                x_embed = x_embed / (x_embed[:, -1:] + eps) * scale
            emb_ref[b, 0, :, :] = y_embed
            emb_ref[b, 1, :, :] = x_embed

    return kernel


# ------------------------ stage 2: sin/cos expansion --------------------------

def _make_expand_kernel(normalize, pure_tile, tc, F):
    # When normalize=True the arguments are bounded (<= ~2*pi*scale) and the single-EUP-pass
    # phase trick sin(x + pi/2) is accurate; for unbounded arguments use exact jnp.cos.
    exact_cos = not normalize

    def kernel(emb_ref, const_ref, out_ref):
        # emb_ref  : (1, 2, L) f32   row 0 = y_embed, row 1 = x_embed (flattened spatial tile)
        # const_ref: (tc, 3)  f32    columns: [1/dim_t, phase (0 or pi/2), sel (1=y, 0=x)]
        # out_ref  : (1, tc, L)
        inv = const_ref[:, 0:1]                 # (tc, 1)
        phase = const_ref[:, 1:2]               # (tc, 1)

        y_row = emb_ref[0, 0:1, :]              # (1, L)
        x_row = emb_ref[0, 1:2, :]              # (1, L)
        if pure_tile:
            # Whole channel tile belongs to one half -> scalar-predicated (1, L) select.
            is_y = (pl.program_id(1) * tc) < F
            e = jnp.where(is_y, y_row, x_row)   # (1, L)
        else:
            # Fallback (F not a multiple of the sublane quantum): per-channel select.
            sel = const_ref[:, 2:3]             # (tc, 1)
            e = jnp.where(sel > 0.5, y_row, x_row)  # (tc, L)

        arg = e * inv                           # (tc, L)
        if exact_cos:
            out = jnp.where(phase > 1.0, jnp.cos(arg), jnp.sin(arg))
        else:
            out = jnp.sin(arg + phase)
        out_ref[0] = out.astype(out_ref.dtype)

    return kernel


def _pick_channel_tile(F, sub):
    """Largest multiple of `sub` that divides F and is <= 64; None if there is none."""
    best = None
    t = sub
    while t <= min(F, 64):
        if F % t == 0:
            best = t
        t += sub
    return best


def _pick_lane_tile(HW):
    """Lane-dim (last dim) tile: full HW when small, else a multiple of 128 <= cap."""
    if HW <= _MAX_LANE_TILE:
        return HW
    cap = _MAX_LANE_TILE - (_MAX_LANE_TILE % 128)
    for l in range(cap, 127, -128):
        if HW % l == 0:
            return l
    return cap  # does not divide HW; Pallas masks the edge block


# --------------------------------- wrapper ------------------------------------

def position_embedding_sine(mask, *, num_pos_feats=64, temperature=10000,
                            normalize=False, scale=None, out_dtype=jnp.float32):
    """mask: (B, H, W) bool (True = padded). Returns (B, 2*num_pos_feats, H, W)."""
    if scale is not None and normalize is False:
        raise ValueError('normalize should be True if scale is passed')
    if scale is None:
        scale = 2 * math.pi

    B, H, W = mask.shape
    F = num_pos_feats
    C = 2 * F
    HW = H * W
    mask_i = mask.astype(jnp.int32)

    # ---- hoisted grid-invariant constants (host-side, built once) ----
    ly = jnp.asarray(np.tril(np.ones((H, H), np.float32)), dtype=jnp.bfloat16)  # cumsum H
    ux = jnp.asarray(np.triu(np.ones((W, W), np.float32)), dtype=jnp.bfloat16)  # cumsum W

    d = np.arange(F, dtype=np.float32)
    dim_t = np.float32(temperature) ** (2.0 * np.floor(d / 2.0) / np.float32(F))
    inv_dim_t = (1.0 / dim_t).astype(np.float32)                                # (F,)
    phase = np.where(np.arange(F) % 2 == 1, np.pi / 2.0, 0.0).astype(np.float32)
    inv_full = np.tile(inv_dim_t, 2)                                            # (C,)
    phase_full = np.tile(phase, 2)
    sel_full = np.concatenate([np.ones(F, np.float32), np.zeros(F, np.float32)])
    const = jnp.asarray(np.stack([inv_full, phase_full, sel_full], axis=1))     # (C, 3) f32

    # ---- stage 1: cumsum / normalize -> (B, 2, H, W) f32 ----
    # Batch several images per grid step; bound the per-step VMEM working set.
    bb = min(B, 8, max(1, (2 * 1024 * 1024) // max(1, H * W * 4)))
    n_b = (B + bb - 1) // bb
    embeds = pl.pallas_call(
        _make_cumsum_kernel(bb, normalize, scale),
        out_shape=jax.ShapeDtypeStruct((B, 2, H, W), jnp.float32),
        grid_spec=pltpu.PrefetchScalarGridSpec(
            num_scalar_prefetch=0,
            grid=(n_b,),
            in_specs=[
                pl.BlockSpec((bb, H, W), lambda i: (i, 0, 0)),
                pl.BlockSpec((H, H), lambda i: (0, 0)),
                pl.BlockSpec((W, W), lambda i: (0, 0)),
            ],
            out_specs=pl.BlockSpec((bb, 2, H, W), lambda i: (i, 0, 0, 0)),
        ),
        compiler_params=pltpu.CompilerParams(
            dimension_semantics=("parallel",),
            vmem_limit_bytes=_VMEM_LIMIT_BYTES),
    )(mask_i, ly, ux)

    # free contiguous reshape: (B, 2, H, W) -> (B, 2, H*W)
    embeds_flat = embeds.reshape(B, 2, HW)

    # ---- stage 2: lane-dense sin/cos expansion -> (B, 2F, H*W) ----
    sub = 8 * max(1, 4 // np.dtype(out_dtype).itemsize)   # sublane quantum for the out dtype
    tc = _pick_channel_tile(F, sub)
    pure_tile = tc is not None
    if not pure_tile:
        tc = C                                            # single full-C block (exempt)
    n_ct = C // tc
    L = _pick_lane_tile(HW)
    n_hw = (HW + L - 1) // L

    out_flat = pl.pallas_call(
        _make_expand_kernel(normalize, pure_tile, tc, F),
        out_shape=jax.ShapeDtypeStruct((B, C, HW), out_dtype),
        grid_spec=pltpu.PrefetchScalarGridSpec(
            num_scalar_prefetch=0,
            grid=(B, n_ct, n_hw),
            in_specs=[
                pl.BlockSpec((1, 2, L), lambda b, ct, s: (b, 0, s)),
                pl.BlockSpec((tc, 3), lambda b, ct, s: (ct, 0)),
            ],
            out_specs=pl.BlockSpec((1, tc, L), lambda b, ct, s: (b, ct, s)),
        ),
        compiler_params=pltpu.CompilerParams(
            dimension_semantics=("parallel", "parallel", "parallel"),
            vmem_limit_bytes=_VMEM_LIMIT_BYTES),
    )(embeds_flat, const)

    # free contiguous reshape back to NCHW
    return out_flat.reshape(B, C, H, W)


# ------------------------------ pure-JAX reference -----------------------------

def position_embedding_sine_ref(mask, *, num_pos_feats=64, temperature=10000,
                                normalize=False, scale=None):
    """Pure-JAX transcription of the PyTorch forward, used for verification."""
    if scale is None:
        scale = 2 * math.pi
    not_mask = (~mask).astype(jnp.float32)
    y_embed = jnp.cumsum(not_mask, axis=1)
    x_embed = jnp.cumsum(not_mask, axis=2)
    if normalize:
        eps = 1e-6
        y_embed = y_embed / (y_embed[:, -1:, :] + eps) * scale
        x_embed = x_embed / (x_embed[:, :, -1:] + eps) * scale
    dim_t = jnp.arange(num_pos_feats, dtype=jnp.float32)
    dim_t = temperature ** (2 * jnp.floor(dim_t / 2) / num_pos_feats)
    pos_x = x_embed[:, :, :, None] / dim_t
    pos_y = y_embed[:, :, :, None] / dim_t
    B, H, W = mask.shape
    pos_x = jnp.stack((jnp.sin(pos_x[:, :, :, 0::2]),
                       jnp.cos(pos_x[:, :, :, 1::2])), axis=4).reshape(B, H, W, -1)
    pos_y = jnp.stack((jnp.sin(pos_y[:, :, :, 0::2]),
                       jnp.cos(pos_y[:, :, :, 1::2])), axis=4).reshape(B, H, W, -1)
    pos = jnp.concatenate((pos_y, pos_x), axis=3).transpose(0, 3, 1, 2)
    return pos


if __name__ == "__main__":
    B, C_in, H, W = 2, 4, 16, 16
    num_pos_feats = 8

    key = jax.random.PRNGKey(0)
    # x is only used for device/dtype in the PyTorch forward; constructed for shape parity.
    x = jax.random.normal(key, (B, C_in, H, W), dtype=jnp.float32)

    # Deterministic DETR-style padding mask (True = padded region).
    mask = jnp.zeros((B, H, W), dtype=bool)
    mask = mask.at[0, :, 12:].set(True)   # image 0 padded on the right
    mask = mask.at[1, 10:, :].set(True)   # image 1 padded on the bottom

    # Default config (normalize=False): exact-cos path.
    out = position_embedding_sine(mask, num_pos_feats=num_pos_feats)
    out = jax.block_until_ready(out)
    ref = position_embedding_sine_ref(mask, num_pos_feats=num_pos_feats)
    assert out.shape == (B, 2 * num_pos_feats, H, W)
    assert jnp.allclose(out, ref, atol=1e-5, rtol=1e-5)

    # Normalized config (as used in DETR): phase-trick path.
    out_n = position_embedding_sine(mask, num_pos_feats=num_pos_feats, normalize=True)
    out_n = jax.block_until_ready(out_n)
    ref_n = position_embedding_sine_ref(mask, num_pos_feats=num_pos_feats, normalize=True)
    assert jnp.allclose(out_n, ref_n, atol=1e-5, rtol=1e-5)

    print("KERNEL_OK")
</pallas_src>

<mosaic_0001>
module attributes {stable_mosaic.version = 11 : i64} {
  func.func @kernel(%arg0: i32, %arg1: memref<2x16x16xi32, #tpu.memory_space<vmem>>, %arg2: memref<16x16xbf16, #tpu.memory_space<vmem>>, %arg3: memref<16x16xbf16, #tpu.memory_space<vmem>>, %arg4: memref<2x2x16x16xf32, #tpu.memory_space<vmem>>) attributes {dimension_semantics = [#tpu.dimension_semantics<parallel>], iteration_bounds = array<i64: 1>, scalar_prefetch = 0 : i64, scratch_operands = 0 : i64, tpu.core_type = #tpu.core_type<tc>, window_params = [{transform_indices = @transform_0, window_bounds = array<i64: 2, 16, 16>}, {pipeline_mode = #tpu.pipeline_mode<synchronous>, transform_indices = @transform_1, window_bounds = array<i64: 16, 16>}, {pipeline_mode = #tpu.pipeline_mode<synchronous>, transform_indices = @transform_2, window_bounds = array<i64: 16, 16>}, {transform_indices = @transform_3, window_bounds = array<i64: 2, 2, 16, 16>}]} {
    %c0 = arith.constant 0 : index
    %c0_0 = arith.constant 0 : index
    %0 = vector.load %arg2[%c0, %c0_0] : memref<16x16xbf16, #tpu.memory_space<vmem>>, vector<16x16xbf16>
    %c0_1 = arith.constant 0 : index
    %c0_2 = arith.constant 0 : index
    %1 = vector.load %arg3[%c0_1, %c0_2] : memref<16x16xbf16, #tpu.memory_space<vmem>>, vector<16x16xbf16>
    %c0_3 = arith.constant 0 : index
    %c0_4 = arith.constant 0 : index
    %c0_5 = arith.constant 0 : index
    %2 = vector.load %arg1[%c0_3, %c0_4, %c0_5] : memref<2x16x16xi32, #tpu.memory_space<vmem>>, vector<1x16x16xi32>
    %3 = vector.shape_cast %2 : vector<1x16x16xi32> to vector<16x16xi32>
    %c1_i32 = arith.constant 1 : i32
    %4 = vector.broadcast %c1_i32 : i32 to vector<16x16xi32>
    %5 = arith.subi %4, %3 : vector<16x16xi32>
    %6 = arith.sitofp %5 : vector<16x16xi32> to vector<16x16xbf16>
    %cst = arith.constant dense<0.000000e+00> : vector<16x16xf32>
    %7 = tpu.matmul %0, %6, %cst {dimension_numbers = #tpu.dot_dimension_numbers<[1], [0], [0], [1], [0, 0, 1, 1], [], []>} : vector<16x16xbf16>, vector<16x16xbf16>, vector<16x16xf32> -> vector<16x16xf32>
    %cst_6 = arith.constant dense<0.000000e+00> : vector<16x16xf32>
    %8 = tpu.matmul %6, %1, %cst_6 {dimension_numbers = #tpu.dot_dimension_numbers<[1], [0], [0], [1], [0, 0, 1, 1], [], []>} : vector<16x16xbf16>, vector<16x16xbf16>, vector<16x16xf32> -> vector<16x16xf32>
    %c0_7 = arith.constant 0 : index
    %c0_8 = arith.constant 0 : index
    %c0_9 = arith.constant 0 : index
    %c0_10 = arith.constant 0 : index
    %9 = vector.load %arg4[%c0_7, %c0_8, %c0_9, %c0_10] : memref<2x2x16x16xf32, #tpu.memory_space<vmem>>, vector<1x1x16x16xf32>
    %10 = vector.shape_cast %9 : vector<1x1x16x16xf32> to vector<16x16xf32>
    %11 = vector.shape_cast %7 : vector<16x16xf32> to vector<1x1x16x16xf32>
    tpu.vector_store %arg4[%c0_7, %c0_8, %c0_9, %c0_10], %11 {strides = array<i32>} : memref<2x2x16x16xf32, #tpu.memory_space<vmem>>, vector<1x1x16x16xf32>,
    %c0_11 = arith.constant 0 : index
    %c1 = arith.constant 1 : index
    %c0_12 = arith.constant 0 : index
    %c0_13 = arith.constant 0 : index
    %12 = vector.load %arg4[%c0_11, %c1, %c0_12, %c0_13] : memref<2x2x16x16xf32, #tpu.memory_space<vmem>>, vector<1x1x16x16xf32>
    %13 = vector.shape_cast %12 : vector<1x1x16x16xf32> to vector<16x16xf32>
    %14 = vector.shape_cast %8 : vector<16x16xf32> to vector<1x1x16x16xf32>
    tpu.vector_store %arg4[%c0_11, %c1, %c0_12, %c0_13], %14 {strides = array<i32>} : memref<2x2x16x16xf32, #tpu.memory_space<vmem>>, vector<1x1x16x16xf32>,
    %c1_14 = arith.constant 1 : index
    %c0_15 = arith.constant 0 : index
    %c0_16 = arith.constant 0 : index
    %15 = vector.load %arg1[%c1_14, %c0_15, %c0_16] : memref<2x16x16xi32, #tpu.memory_space<vmem>>, vector<1x16x16xi32>
    %16 = vector.shape_cast %15 : vector<1x16x16xi32> to vector<16x16xi32>
    %c1_i32_17 = arith.constant 1 : i32
    %17 = vector.broadcast %c1_i32_17 : i32 to vector<16x16xi32>
    %18 = arith.subi %17, %16 : vector<16x16xi32>
    %19 = arith.sitofp %18 : vector<16x16xi32> to vector<16x16xbf16>
    %cst_18 = arith.constant dense<0.000000e+00> : vector<16x16xf32>
    %20 = tpu.matmul %0, %19, %cst_18 {dimension_numbers = #tpu.dot_dimension_numbers<[1], [0], [0], [1], [0, 0, 1, 1], [], []>} : vector<16x16xbf16>, vector<16x16xbf16>, vector<16x16xf32> -> vector<16x16xf32>
    %cst_19 = arith.constant dense<0.000000e+00> : vector<16x16xf32>
    %21 = tpu.matmul %19, %1, %cst_19 {dimension_numbers = #tpu.dot_dimension_numbers<[1], [0], [0], [1], [0, 0, 1, 1], [], []>} : vector<16x16xbf16>, vector<16x16xbf16>, vector<16x16xf32> -> vector<16x16xf32>
    %c1_20 = arith.constant 1 : index
    %c0_21 = arith.constant 0 : index
    %c0_22 = arith.constant 0 : index
    %c0_23 = arith.constant 0 : index
    %22 = vector.load %arg4[%c1_20, %c0_21, %c0_22, %c0_23] : memref<2x2x16x16xf32, #tpu.memory_space<vmem>>, vector<1x1x16x16xf32>
    %23 = vector.shape_cast %22 : vector<1x1x16x16xf32> to vector<16x16xf32>
    %24 = vector.shape_cast %20 : vector<16x16xf32> to vector<1x1x16x16xf32>
    tpu.vector_store %arg4[%c1_20, %c0_21, %c0_22, %c0_23], %24 {strides = array<i32>} : memref<2x2x16x16xf32, #tpu.memory_space<vmem>>, vector<1x1x16x16xf32>,
    %c1_24 = arith.constant 1 : index
    %c1_25 = arith.constant 1 : index
    %c0_26 = arith.constant 0 : index
    %c0_27 = arith.constant 0 : index
    %25 = vector.load %arg4[%c1_24, %c1_25, %c0_26, %c0_27] : memref<2x2x16x16xf32, #tpu.memory_space<vmem>>, vector<1x1x16x16xf32>
    %26 = vector.shape_cast %25 : vector<1x1x16x16xf32> to vector<16x16xf32>
    %27 = vector.shape_cast %21 : vector<16x16xf32> to vector<1x1x16x16xf32>
    tpu.vector_store %arg4[%c1_24, %c1_25, %c0_26, %c0_27], %27 {strides = array<i32>} : memref<2x2x16x16xf32, #tpu.memory_space<vmem>>, vector<1x1x16x16xf32>,
    return
  }
  func.func @transform_0(%arg0: i32) -> (i32, i32, i32) {
    %c0_i32 = arith.constant 0 : i32
    %c0_i32_0 = arith.constant 0 : i32
    %c0_i32_1 = arith.constant 0 : i32
    return %arg0, %c0_i32, %c0_i32_0 : i32, i32, i32
  }
  func.func @transform_1(%arg0: i32) -> (i32, i32) {
    %c0_i32 = arith.constant 0 : i32
    %c0_i32_0 = arith.constant 0 : i32
    %c0_i32_1 = arith.constant 0 : i32
    return %c0_i32, %c0_i32_0 : i32, i32
  }
  func.func @transform_2(%arg0: i32) -> (i32, i32) {
    %c0_i32 = arith.constant 0 : i32
    %c0_i32_0 = arith.constant 0 : i32
    %c0_i32_1 = arith.constant 0 : i32
    return %c0_i32, %c0_i32_0 : i32, i32
  }
  func.func @transform_3(%arg0: i32) -> (i32, i32, i32, i32) {
    %c0_i32 = arith.constant 0 : i32
    %c0_i32_0 = arith.constant 0 : i32
    %c0_i32_1 = arith.constant 0 : i32
    %c0_i32_2 = arith.constant 0 : i32
    return %arg0, %c0_i32, %c0_i32_0, %c0_i32_1 : i32, i32, i32, i32
  }
}

</mosaic_0001>

<bundles_post_ra>
// kernel: tpu_custom_call.1
= control target key start
LH: loop header
LB: loop body
LE: loop exit
PB: predicated region body
PF: predicated region fallthrough
CT: control target
= control target key end

     0   :  { %8 = vsyncpa [#allocation3], 0  ;;  %s490_s0 = inlined_call_operand.hbm [shape: s32[2,16,16], index: 0, kind: input, shape index: {}]   ;;  %s491_s1 = inlined_call_operand.hbm [shape: bf16[16,16], index: 1, kind: input, shape index: {}]   ;;  %s492_s2 = inlined_call_operand.hbm [shape: bf16[16,16], index: 2, kind: input, shape index: {}]   ;;  %s493_s3 = inlined_call_operand.hbm [shape: f32[2,2,16,16], index: 3, kind: output, shape index: {}]  }
   0x1   :  { %9 = vsyncpa [#allocation6], 0 }
   0x2   :  { %10 = vsyncpa [#allocation4], 0  ;;  %s426_s12 = smov [#allocation5]  }
   0x3   :  { %s28_s13 = sshll.u32 %s426_s12, 4  ;;  %s29_s13 = int_to_ptr.vmem [resolvable:$true] %s28_s13 }
   0x4   :  { %s348_s14 = scalar_lea.vmem %s29_s13, 128  ;;  %p353_p1 = scmp.lt.s32.totalorder %s29_s13, %s29_s13 }
   0x5   :  { %p349_p0 = scmp.ne.s32.totalorder %s29_s13, %s348_s14  ;;  %p354_p2 = scmp.lt.s32.totalorder %s348_s14, %s348_s14 }
   0x7   :  { %p355_p3 = por %p354_p2, %p353_p1 }
   0x9   :  { %p356_p4 = pnand %p355_p3, %p349_p0 }
   0xb   :  { %359 = shalt.err (!%p356_p4)
}
   0xc   :  { %s427_s15 = smov 64   ;;  %s428_s16 = smov 4  }
   0xd   :  { %34 = dma.hbm_to_vmem [thread:$0]  %s491_s1, 128, %s29_s13, [#allocation6], %s427_s15, %s427_s15, %s428_s16  }
   0xe   :  { %s429_s19 = smov [#allocation2]  }
   0xf   :  { %s16_s20 = sshll.u32 %s429_s19, 4  ;;  %s17_s20 = int_to_ptr.vmem [resolvable:$true] %s16_s20 }
  0x10   :  { %s368_s21 = scalar_lea.vmem %s17_s20, 512  ;;  %p373_p6 = scmp.lt.s32.totalorder %s17_s20, %s17_s20 }
  0x11   :  { %p369_p5 = scmp.ne.s32.totalorder %s17_s20, %s368_s21  ;;  %p374_p7 = scmp.lt.s32.totalorder %s368_s21, %s368_s21 }
  0x13   :  { %p375_p8 = por %p374_p7, %p373_p6 }
  0x15   :  { %p376_p9 = pnand %p375_p8, %p369_p5 }
  0x17   :  { %379 = shalt.err (!%p376_p9)
}
  0x18   :  { %s430_s22 = smov 128   ;;  %s431_s23 = smov 8  }
  0x19   :  { %22 = dma.hbm_to_vmem [thread:$0]  %s490_s0, 512, %s17_s20, [#allocation3], %s430_s22, %s430_s22, %s431_s23  }
  0x1a   :  { %s432_s1 = smov [#allocation7]  }
  0x1b   :  { %s40_s26 = sshll.u32 %s432_s1, 4  ;;  %s41_s26 = int_to_ptr.vmem [resolvable:$true] %s40_s26 }
  0x1c   :  { %s388_s27 = scalar_lea.vmem %s41_s26, 128  ;;  %p393_p11 = scmp.lt.s32.totalorder %s41_s26, %s41_s26 }
  0x1d   :  { %p389_p10 = scmp.ne.s32.totalorder %s41_s26, %s388_s27  ;;  %p394_p12 = scmp.lt.s32.totalorder %s388_s27, %s388_s27 }
  0x1f   :  { %p395_p13 = por %p394_p12, %p393_p11 }
  0x21   :  { %p396_p0 = pnand %p395_p13, %p389_p10 }
  0x23   :  { %399 = shalt.err (!%p396_p0)
}
  0x24   :  { %46 = dma.hbm_to_vmem [thread:$0]  %s492_s2, 128, %s41_s26, [#allocation6], %s427_s15, %s427_s15, %s428_s16  }
  0x25   :  { %420 = dma.done.wait [#allocation3], 512  }
  0x26   :  { %421 = vsyncadd [#allocation3], 4294966784 }
  0x27   :  { %422 = dma.done.wait [#allocation6], 256  }
  0x28   :  { %423 = vsyncadd [#allocation6], 4294967040  ;;  %v433_v0 = vmov 0.0   ;;  %vm434_vm0 = vmmov 0   ;;  %v338_v1 = vld [vmem:[#allocation7] sm:$0xff]   ;;  %v61_v2 = vld [vmem:[#allocation2] sm:$0xff] }
  0x29   :  { %310 = vmatprep.subr.bf16.mxu1 %v433_v0  ;;  %304 = vmatprep.subr.bf16.mxu0 %v433_v0  ;;  %v62_v3 = vld [vmem:[#allocation2 + $0x8] sm:$0xff]  ;;  %v63_v4 = vsub.s32 1, %v61_v2  ;;  %v174_v6 = vld [vmem:[#allocation2 + $0x10] sm:$0xff]  ;;  %v175_v7 = vld [vmem:[#allocation2 + $0x18] sm:$0xff]  ;;  %vm73_vm1 = vcmask 130048   ;;  %s435_s0 = smov [#allocation8]  }
  0x2a   :  { %312 = vmatprep.mubr.msk.bf16.mxu1 %vm434_vm0, %v433_v0  ;;  %306 = vmatprep.mubr.msk.bf16.mxu0 %vm434_vm0, %v433_v0  ;;  %v64_v5 = vsub.s32 1, %v62_v3  ;;  %v176_v8 = vsub.s32 1, %v174_v6  ;;  %v177_v11 = vsub.s32 1, %v175_v7  ;;  %v339_v15 = vld [vmem:[#allocation5] sm:$0xff]   ;;  %s277_s2 = sshll.u32 %s435_s0, 4  ;;  %s278_s2 = int_to_ptr.vmem [resolvable:$true] %s277_s2 }
  0x2b   :  { %311 = vmatpush3.bf16.msra.mxu1 %v338_v1  ;;  %v65_v9 = vcvt.s32.f32 %v63_v4  ;;  %s400_s30 = scalar_lea.vmem %s278_s2, 1024  ;;  %p405_p2 = scmp.lt.s32.totalorder %s278_s2, %s278_s2 }
  0x2c   :  { %322 = vmatprep.subr.bf16.mxu1 %v433_v0  ;;  %v66_v10 = vcvt.s32.f32 %v64_v5  ;;  %v178_v12 = vcvt.s32.f32 %v176_v8  ;;  %v179_v14 = vcvt.s32.f32 %v177_v11  ;;  %p401_p1 = scmp.ne.s32.totalorder %s278_s2, %s400_s30  ;;  %p406_p3 = scmp.lt.s32.totalorder %s400_s30, %s400_s30 }
  0x2e   :  { %v67_v13 = vpack.c.bf16 %v66_v10, %v65_v9  ;;  %v180_v16 = vpack.c.bf16 %v179_v14, %v178_v12  ;;  %p407_p4 = por %p406_p3, %p405_p2 }
  0x30   :  { %305 = vmatpush3.bf16.msra.mxu0 %v67_v13  ;;  %313 = vmatmul.mubr.msk.bf16.vlgmr.msra.gmra.mxu1 %vm73_vm1, %v67_v13  ;;  %p408_p5 = pnand %p407_p4, %p401_p1 }
  0x31   :  { %316 = vmatprep.subr.bf16.mxu0 %v433_v0  ;;  %323 = vmatpush3.bf16.msra.mxu1 %v338_v1 }
  0x32   :  { %324 = vmatprep.mubr.msk.bf16.mxu1 %vm434_vm0, %v433_v0 }
  0x33   :  { %307 = vmatmul.mubr.msk.bf16.vlgmr.msra.gmra.mxu0 %vm73_vm1, %v339_v15 }
  0x34   :  { %317 = vmatpush3.bf16.msra.mxu0 %v180_v16  ;;  %318 = vmatprep.mubr.msk.bf16.mxu0 %vm434_vm0, %v433_v0 }
  0x38   :  { %325 = vmatmul.mubr.msk.bf16.vlgmr.msra.gmra.mxu1 %vm73_vm1, %v180_v16 }
  0x3b   :  { %319 = vmatmul.mubr.msk.bf16.vlgmr.msra.gmra.mxu0 %vm73_vm1, %v339_v15 }
  0xf0   :  { %v161_v17 = vpop.f32.mrf.mxu1 }
  0xf1   :  { %171 = vst.msk [vmem:[#allocation8 + $0x10] sm:$0xff] %vm73_vm1, %v161_v17 }
  0xf2   :  { %v314_v18 = vpop.f32.mrf.mxu1 }
  0xf3   :  { %v111_v19 = vpop.f32.mrf.mxu0 }
  0xf4   :  { %168 = vst.msk [vmem:[#allocation8] sm:$0xff] %vm73_vm1, %v111_v19  ;;  %v164_v20 = vpop.f32.mrf.mxu1 }
  0xf5   :  { %172 = vst.msk [vmem:[#allocation8 + $0x18] sm:$0xff] %vm73_vm1, %v164_v20  ;;  %v308_v21 = vpop.f32.mrf.mxu0 }
  0xf6   :  { %v315_v22 = vpop.f32.mrf.mxu1 }
  0xf7   :  { %v114_v23 = vpop.f32.mrf.mxu0 }
  0xf8   :  { %169 = vst.msk [vmem:[#allocation8 + $0x8] sm:$0xff] %vm73_vm1, %v114_v23  ;;  %v259_v24 = vpop.f32.mrf.mxu1 }
  0xf9   :  { %270 = vst.msk [vmem:[#allocation8 + $0x30] sm:$0xff] %vm73_vm1, %v259_v24  ;;  %v309_v25 = vpop.f32.mrf.mxu0 }
  0xfa   :  { %v326_v26 = vpop.f32.mrf.mxu1 }
  0xfb   :  { %v215_v27 = vpop.f32.mrf.mxu0 }
  0xfc   :  { %267 = vst.msk [vmem:[#allocation8 + $0x20] sm:$0xff] %vm73_vm1, %v215_v27  ;;  %v262_v28 = vpop.f32.mrf.mxu1 }
  0xfd   :  { %271 = vst.msk [vmem:[#allocation8 + $0x38] sm:$0xff] %vm73_vm1, %v262_v28  ;;  %v320_v29 = vpop.f32.mrf.mxu0 }
  0xfe   :  { %v327_v30 = vpop.f32.mrf.mxu1 }
  0xff   :  { %v218_v31 = vpop.f32.mrf.mxu0 }
 0x100   :  { %268 = vst.msk [vmem:[#allocation8 + $0x28] sm:$0xff] %vm73_vm1, %v218_v31 }
 0x101   :  { %v321_v32 = vpop.f32.mrf.mxu0 }
 0x102   :  { %411 = shalt.err (!%p408_p5)
}
 0x103   :  { %283 = dma.vmem_to_hbm [thread:$0]  %s278_s2, 1024, %s493_s3, [#allocation4], %s430_s22, %s430_s22, %s431_s23  }
 0x104   :  { %424 = dma.done.wait [#allocation4], 1024  }
 0x105   :  { %425 = vsyncadd [#allocation4], 4294966272 }
 0x106   :  { %287 = vsyncpa [#allocation3], 1 }
 0x107   :  { %288 = vsyncpa [#allocation6], 1 }
 0x108   :  { %289 = vsyncpa [#allocation4], 1 }

</bundles_post_ra>
